<compile_context>
chip_gen: v6e
topology: v6e:2x2x1
jax: 0.10.0
libtpu: 0.0.40
codegen_flags: <defaults>
</compile_context>

<pallas_src>
import jax
import jax.numpy as jnp
import numpy as np
from jax.experimental import pallas as pl
from jax.experimental.pallas import tpu as pltpu

_BN_EPS = 1e-5
_MIB = 1024 * 1024


def _cdiv(a, b):
    return -(-a // b)


def _round_up(n, m):
    return _cdiv(n, m) * m


# ---------------------------- Pallas kernels --------------------------------

def _matmul_kernel(p_ref, w_ref, shift_ref, o_ref, acc_ref):
    # acc += patches @ W  over the K grid axis; finalize with shift + ReLU.
    k = pl.program_id(1)

    @pl.when(k == 0)
    def _():
        acc_ref[...] = jnp.zeros_like(acc_ref)

    acc_ref[...] += jnp.dot(p_ref[...], w_ref[...],
                            preferred_element_type=jnp.float32)

    @pl.when(k == pl.num_programs(1) - 1)
    def _():
        o_ref[...] = jnp.maximum(acc_ref[...] + shift_ref[...],
                                 0.0).astype(o_ref.dtype)


def _matmul_res_kernel(p_ref, w_ref, shift_ref, res_ref, o_ref, acc_ref):
    # Identity shortcut: residual added in f32 at finalize (residual is bf16).
    k = pl.program_id(1)

    @pl.when(k == 0)
    def _():
        acc_ref[...] = jnp.zeros_like(acc_ref)

    acc_ref[...] += jnp.dot(p_ref[...], w_ref[...],
                            preferred_element_type=jnp.float32)

    @pl.when(k == pl.num_programs(1) - 1)
    def _():
        r = acc_ref[...] + shift_ref[...] + res_ref[...].astype(jnp.float32)
        o_ref[...] = jnp.maximum(r, 0.0).astype(o_ref.dtype)


# --------------------------- VMEM-aware tile planner -------------------------

def _vmem_budget_bytes():
    # Working budget for the pipeline buffers; leave >half of VMEM for Mosaic.
    try:
        cap = int(pltpu.get_tpu_info().vmem_capacity_bytes)
    except Exception:
        cap = 64 * _MIB
    return min(cap // 3, 24 * _MIB)


def _vmem_need(tm, tk, nk, cout, res_isz, out_isz):
    patches = 2 * tm * tk * 2                      # bf16, double-buffered
    weight = (1 if nk == 1 else 2) * tk * cout * 2  # single-buffered if un-split
    shift = cout * 4                               # f32, single buffer
    resid = 2 * tm * cout * res_isz
    out = 2 * tm * cout * out_isz
    acc = tm * cout * 4                            # f32 accumulator scratch
    return patches + weight + shift + resid + out + acc


def _plan(M, K, cout, res_isz, out_isz):
    """Pick (tm, tk, nk) so the estimated VMEM footprint fits the budget."""
    assert K % 128 == 0
    budget = _vmem_budget_bytes()
    mp128 = _round_up(M, 128)
    tm_cap = mp128
    if mp128 >= 256:
        # Keep at least two M tiles so both v7x TensorCores get work.
        tm_cap = min(tm_cap, _round_up(_cdiv(mp128, 2), 128))
    tm_opts = [t for t in (512, 256, 128) if t <= tm_cap] or [tm_cap]
    k128 = K // 128
    nk_opts = [d for d in range(1, min(k128, 16) + 1) if k128 % d == 0]
    best = None
    for tm in tm_opts:                 # prefer large tm (lane/DMA-dense stores)
        for nk in nk_opts:             # then minimal K splitting
            tk = K // nk
            need = _vmem_need(tm, tk, nk, cout, res_isz, out_isz)
            if need <= budget:
                return tm, tk, nk, need
            if best is None or need < best[3]:
                best = (tm, tk, nk, need)
    return best


# ----------------------------- pallas_call wrapper ---------------------------

def fused_matmul(patches, w, shift, *, residual=None, out_dtype=jnp.bfloat16):
    """relu(patches @ w + shift [+ residual]) on an (M-tiles, K-tiles) grid."""
    M, K = patches.shape
    Kw, cout = w.shape
    assert Kw == K and shift.shape == (1, cout)
    if residual is not None:
        assert residual.shape == (M, cout)

    res_isz = residual.dtype.itemsize if residual is not None else 0
    out_isz = np.dtype(out_dtype).itemsize
    tm, tk, nk, need = _plan(M, K, cout, res_isz, out_isz)

    Mp = _round_up(M, tm)
    if Mp != M:
        patches = jnp.pad(patches, ((0, Mp - M), (0, 0)))
        if residual is not None:
            residual = jnp.pad(residual, ((0, Mp - M), (0, 0)))

    # Weight block is constant across the grid when K is un-split; the shift
    # block is always constant -> single-buffer them (review feedback).
    w_kwargs = {"pipeline_mode": pl.Buffered(1)} if nk == 1 else {}
    in_specs = [
        pl.BlockSpec((tm, tk), lambda i, k: (i, k)),
        pl.BlockSpec((tk, cout), lambda i, k: (k, 0), **w_kwargs),
        pl.BlockSpec((1, cout), lambda i, k: (0, 0),
                     pipeline_mode=pl.Buffered(1)),
    ]
    args = [patches, w, shift]
    if residual is None:
        kernel = _matmul_kernel
    else:
        kernel = _matmul_res_kernel
        in_specs.append(pl.BlockSpec((tm, cout), lambda i, k: (i, 0)))
        args.append(residual)

    bytes_accessed = sum(int(a.size) * a.dtype.itemsize for a in args)
    bytes_accessed += Mp * cout * out_isz
    cost = pl.CostEstimate(flops=2 * Mp * K * cout, transcendentals=0,
                           bytes_accessed=int(bytes_accessed))

    vmem_limit = int(min(max(need * 3 // 2 + 4 * _MIB, 24 * _MIB), 50 * _MIB))

    out = pl.pallas_call(
        kernel,
        out_shape=jax.ShapeDtypeStruct((Mp, cout), out_dtype),
        grid=(Mp // tm, nk),
        in_specs=in_specs,
        out_specs=pl.BlockSpec((tm, cout), lambda i, k: (i, 0)),
        scratch_shapes=[pltpu.VMEM((tm, cout), jnp.float32)],
        compiler_params=pltpu.CompilerParams(
            dimension_semantics=("parallel", "arbitrary"),
            vmem_limit_bytes=vmem_limit),
        cost_estimate=cost,
    )(*args)
    return out[:M] if Mp != M else out


# ------------------------------- glue (plain JAX) ----------------------------

def im2col(x_nhwc, k, stride, pad, extra=None, lane_multiple=128):
    """Extract kxk patches (+ optional extra channels); pad K to lane multiple.

    Returns ([N*Ho*Wo, Kp], Ho, Wo).  The K zero-padding is fused into the
    concat (no standalone padded copy).
    """
    N, H, W, C = x_nhwc.shape
    xp = jnp.pad(x_nhwc, ((0, 0), (pad, pad), (pad, pad), (0, 0)))
    Ho = (H + 2 * pad - k) // stride + 1
    Wo = (W + 2 * pad - k) // stride + 1
    cols = []
    for dy in range(k):
        for dx in range(k):
            cols.append(xp[:, dy:dy + stride * (Ho - 1) + 1:stride,
                           dx:dx + stride * (Wo - 1) + 1:stride, :])
    if extra is not None:
        cols.append(extra)
    Ktot = sum(c.shape[-1] for c in cols)
    Kp = _round_up(Ktot, lane_multiple)
    if Kp != Ktot:
        cols.append(jnp.zeros((N, Ho, Wo, Kp - Ktot), x_nhwc.dtype))
    p = jnp.concatenate(cols, axis=-1)  # (N, Ho, Wo, Kp)
    return p.reshape(N * Ho * Wo, Kp), Ho, Wo


def _pad_rows(a, rows):
    return jnp.pad(a, ((0, rows - a.shape[0]), (0, 0)))


def bn_fold(bn):
    # Eval-mode fold: y = gamma*(x-mean)/sqrt(var+eps) + beta
    scale = bn["gamma"] / jnp.sqrt(bn["var"] + _BN_EPS)
    shift = bn["beta"] - bn["mean"] * scale
    return scale, shift


def init_params(key, in_planes, planes, stride):
    ks = jax.random.split(key, 12)

    def he(k, shape, fan_in):
        return jax.random.normal(k, shape, jnp.float32) * (2.0 / fan_in) ** 0.5

    def bn(kg, kb, km, kv, c):
        return dict(
            gamma=1.0 + 0.1 * jax.random.normal(kg, (c,), jnp.float32),
            beta=0.1 * jax.random.normal(kb, (c,), jnp.float32),
            mean=0.1 * jax.random.normal(km, (c,), jnp.float32),
            var=0.5 + jax.random.uniform(kv, (c,), jnp.float32),
        )

    p = {
        # conv weights stored HWIO (kh, kw, Cin, Cout)
        "w1": he(ks[0], (3, 3, in_planes, planes), 9 * in_planes),
        "w2": he(ks[1], (3, 3, planes, planes), 9 * planes),
        "bn1": bn(ks[2], ks[3], ks[4], ks[5], planes),
        "bn2": bn(ks[6], ks[7], ks[8], ks[9], planes),
    }
    if stride != 1 or in_planes != planes:
        p["wsc"] = he(ks[10], (in_planes, planes), in_planes)  # 1x1 conv
        p["bn_sc"] = bn(*jax.random.split(ks[11], 4), planes)
    return p


def basic_block_forward(x_nchw, params, stride):
    x = jnp.transpose(x_nchw, (0, 2, 3, 1)).astype(jnp.float32)  # NCHW -> NHWC
    N, H, W, Cin = x.shape
    planes = params["w1"].shape[-1]

    s1, b1 = bn_fold(params["bn1"])
    s2, b2 = bn_fold(params["bn2"])
    x_bf = x.astype(jnp.bfloat16)

    # ---- conv1 (3x3, stride) + bn1 + relu, output at natural width, bf16 ----
    p1, Ho, Wo = im2col(x_bf, 3, stride, 1)
    w1 = (params["w1"] * s1).reshape(9 * Cin, planes)       # BN scale folded
    w1p = _pad_rows(w1, p1.shape[1]).astype(jnp.bfloat16)
    out1 = fused_matmul(p1, w1p, b1.reshape(1, planes), out_dtype=jnp.bfloat16)
    out1 = out1.reshape(N, Ho, Wo, planes)                   # bf16 intermediate

    # ---- conv2 (3x3, s=1) + bn2 + shortcut + relu ----
    w2 = (params["w2"] * s2).reshape(9 * planes, planes)
    has_proj = (stride != 1) or (Cin != planes)
    if has_proj:
        # Projection shortcut fused as extra K columns of ONE matmul.
        ssc, bsc = bn_fold(params["bn_sc"])
        x_sc = x_bf[:, ::stride, ::stride, :]                # (N, Ho, Wo, Cin)
        p2, _, _ = im2col(out1, 3, 1, 1, extra=x_sc)
        wcat = jnp.concatenate([w2, params["wsc"] * ssc], axis=0)
        wcatp = _pad_rows(wcat, p2.shape[1]).astype(jnp.bfloat16)
        shift = (b2 + bsc).reshape(1, planes)
        out = fused_matmul(p2, wcatp, shift, out_dtype=jnp.bfloat16)
    else:
        # Identity shortcut: bf16 residual at natural width, f32 add in kernel.
        p2, _, _ = im2col(out1, 3, 1, 1)
        w2p = _pad_rows(w2, p2.shape[1]).astype(jnp.bfloat16)
        res = x_bf.reshape(N * H * W, Cin)
        out = fused_matmul(p2, w2p, b2.reshape(1, planes), residual=res,
                           out_dtype=jnp.bfloat16)

    out = out.reshape(N, Ho, Wo, planes).astype(jnp.float32)
    return jnp.transpose(out, (0, 3, 1, 2))  # NHWC -> NCHW


# ------------------------------- reference -----------------------------------
# Same math (eval-mode BN folded, bf16 conv inputs, f32 accumulation) so the
# comparison isolates the Pallas lowering from bf16 quantization.

def ref_forward(x_nchw, params, stride):
    x = jnp.transpose(x_nchw, (0, 2, 3, 1)).astype(jnp.float32)
    Cin = x.shape[-1]
    planes = params["w1"].shape[-1]
    s1, b1 = bn_fold(params["bn1"])
    s2, b2 = bn_fold(params["bn2"])

    def conv(y, w, s, p):
        return jax.lax.conv_general_dilated(
            y.astype(jnp.bfloat16), w.astype(jnp.bfloat16),
            (s, s), ((p, p), (p, p)),
            dimension_numbers=("NHWC", "HWIO", "NHWC"),
            preferred_element_type=jnp.float32)

    o1 = jax.nn.relu(conv(x, params["w1"] * s1, stride, 1) + b1)
    o1 = o1.astype(jnp.bfloat16)
    o = conv(o1, params["w2"] * s2, 1, 1) + b2
    if stride != 1 or Cin != planes:
        ssc, bsc = bn_fold(params["bn_sc"])
        wsc = (params["wsc"] * ssc).reshape(1, 1, Cin, planes)
        sc = conv(x, wsc, stride, 0) + bsc
    else:
        sc = x
    out = jax.nn.relu(o + sc)
    return jnp.transpose(out, (0, 3, 1, 2))


if __name__ == "__main__":
    key = jax.random.PRNGKey(0)

    configs = [
        # (name, in_planes, planes, stride, H=W)
        ("projection", 4, 8, 2, 16),   # exercises fused 1x1-conv shortcut
        ("identity",   8, 8, 1, 16),   # exercises identity-add shortcut
    ]
    for name, cin, planes, stride, hw in configs:
        kx, kp, key = jax.random.split(key, 3)
        x = jax.random.normal(kx, (2, cin, hw, hw), jnp.float32)  # NCHW
        params = init_params(kp, cin, planes, stride)

        out = jax.block_until_ready(basic_block_forward(x, params, stride))
        ref = jax.block_until_ready(ref_forward(x, params, stride))

        ho = (hw - 1) // stride + 1
        assert out.shape == (2, planes, ho, ho), (name, out.shape)
        np.testing.assert_allclose(np.asarray(out), np.asarray(ref),
                                   rtol=2e-2, atol=2e-2)

    print("KERNEL_OK")
</pallas_src>

<mosaic_0001>
module attributes {stable_mosaic.version = 11 : i64} {
  func.func @_matmul_kernel(%arg0: i32, %arg1: i32, %arg2: memref<128x128xbf16, #tpu.memory_space<vmem>>, %arg3: memref<128x8xbf16, #tpu.memory_space<vmem>>, %arg4: memref<1x8xf32, #tpu.memory_space<vmem>>, %arg5: memref<128x8xbf16, #tpu.memory_space<vmem>>, %arg6: memref<128x8xf32, #tpu.memory_space<vmem>>) attributes {dimension_semantics = [#tpu.dimension_semantics<parallel>, #tpu.dimension_semantics<arbitrary>], iteration_bounds = array<i64: 1, 1>, scalar_prefetch = 0 : i64, scratch_operands = 1 : i64, tpu.core_type = #tpu.core_type<tc>, window_params = [{transform_indices = @transform_0, window_bounds = array<i64: 128, 128>}, {pipeline_mode = #tpu.pipeline_mode<synchronous>, transform_indices = @transform_1, window_bounds = array<i64: 128, 8>}, {pipeline_mode = #tpu.pipeline_mode<synchronous>, transform_indices = @transform_2, window_bounds = array<i64: 1, 8>}, {transform_indices = @transform_3, window_bounds = array<i64: 128, 8>}]} {
    %c0_i32 = arith.constant 0 : i32
    %0 = arith.cmpi eq, %arg1, %c0_i32 : i32
    %1 = arith.extui %0 : i1 to i32
    %c0_i32_0 = arith.constant 0 : i32
    %2 = arith.cmpi ne, %1, %c0_i32_0 : i32
    scf.if %2 {
      %cst_10 = arith.constant 0.000000e+00 : f32
      %12 = vector.broadcast %cst_10 : f32 to vector<128x8xf32>
      %c0_11 = arith.constant 0 : index
      %c0_12 = arith.constant 0 : index
      %13 = vector.load %arg6[%c0_11, %c0_12] : memref<128x8xf32, #tpu.memory_space<vmem>>, vector<128x8xf32>
      tpu.vector_store %arg6[%c0_11, %c0_12], %12 {strides = array<i32>} : memref<128x8xf32, #tpu.memory_space<vmem>>, vector<128x8xf32>,
    } else {
    }
    %c0 = arith.constant 0 : index
    %c0_1 = arith.constant 0 : index
    %3 = vector.load %arg6[%c0, %c0_1] : memref<128x8xf32, #tpu.memory_space<vmem>>, vector<128x8xf32>
    %c0_2 = arith.constant 0 : index
    %c0_3 = arith.constant 0 : index
    %4 = vector.load %arg2[%c0_2, %c0_3] : memref<128x128xbf16, #tpu.memory_space<vmem>>, vector<128x128xbf16>
    %c0_4 = arith.constant 0 : index
    %c0_5 = arith.constant 0 : index
    %5 = vector.load %arg3[%c0_4, %c0_5] : memref<128x8xbf16, #tpu.memory_space<vmem>>, vector<128x8xbf16>
    %cst = arith.constant dense<0.000000e+00> : vector<128x8xf32>
    %6 = tpu.matmul %4, %5, %cst {dimension_numbers = #tpu.dot_dimension_numbers<[1], [0], [0], [1], [0, 0, 1, 1], [], []>} : vector<128x128xbf16>, vector<128x8xbf16>, vector<128x8xf32> -> vector<128x8xf32>
    %7 = arith.addf %3, %6 : vector<128x8xf32>
    %c0_6 = arith.constant 0 : index
    %c0_7 = arith.constant 0 : index
    %8 = vector.load %arg6[%c0_6, %c0_7] : memref<128x8xf32, #tpu.memory_space<vmem>>, vector<128x8xf32>
    tpu.vector_store %arg6[%c0_6, %c0_7], %7 {strides = array<i32>} : memref<128x8xf32, #tpu.memory_space<vmem>>, vector<128x8xf32>,
    %c0_i32_8 = arith.constant 0 : i32
    %9 = arith.cmpi eq, %arg1, %c0_i32_8 : i32
    %10 = arith.extui %9 : i1 to i32
    %c0_i32_9 = arith.constant 0 : i32
    %11 = arith.cmpi ne, %10, %c0_i32_9 : i32
    scf.if %11 {
      %c0_10 = arith.constant 0 : index
      %c0_11 = arith.constant 0 : index
      %12 = vector.load %arg6[%c0_10, %c0_11] : memref<128x8xf32, #tpu.memory_space<vmem>>, vector<128x8xf32>
      %c0_12 = arith.constant 0 : index
      %c0_13 = arith.constant 0 : index
      %13 = vector.load %arg4[%c0_12, %c0_13] : memref<1x8xf32, #tpu.memory_space<vmem>>, vector<1x8xf32>
      %14 = vector.broadcast %13 : vector<1x8xf32> to vector<128x8xf32>
      %15 = arith.addf %12, %14 : vector<128x8xf32>
      %cst_14 = arith.constant 0.000000e+00 : f32
      %16 = vector.broadcast %cst_14 : f32 to vector<128x8xf32>
      %17 = arith.maximumf %15, %16 : vector<128x8xf32>
      %18 = arith.truncf %17 : vector<128x8xf32> to vector<128x8xbf16>
      %c0_15 = arith.constant 0 : index
      %c0_16 = arith.constant 0 : index
      %19 = vector.load %arg5[%c0_15, %c0_16] : memref<128x8xbf16, #tpu.memory_space<vmem>>, vector<128x8xbf16>
      tpu.vector_store %arg5[%c0_15, %c0_16], %18 {strides = array<i32>} : memref<128x8xbf16, #tpu.memory_space<vmem>>, vector<128x8xbf16>,
    } else {
    }
    return
  }
  func.func @transform_0(%arg0: i32, %arg1: i32) -> (i32, i32) {
    %c0_i32 = arith.constant 0 : i32
    return %arg0, %arg1 : i32, i32
  }
  func.func @transform_1(%arg0: i32, %arg1: i32) -> (i32, i32) {
    %c0_i32 = arith.constant 0 : i32
    %c0_i32_0 = arith.constant 0 : i32
    return %arg1, %c0_i32 : i32, i32
  }
  func.func @transform_2(%arg0: i32, %arg1: i32) -> (i32, i32) {
    %c0_i32 = arith.constant 0 : i32
    %c0_i32_0 = arith.constant 0 : i32
    %c0_i32_1 = arith.constant 0 : i32
    return %c0_i32, %c0_i32_0 : i32, i32
  }
  func.func @transform_3(%arg0: i32, %arg1: i32) -> (i32, i32) {
    %c0_i32 = arith.constant 0 : i32
    %c0_i32_0 = arith.constant 0 : i32
    return %arg0, %c0_i32 : i32, i32
  }
}

</mosaic_0001>

<bundles_post_ra>
// kernel: tpu_custom_call.1
= control target key start
LH: loop header
LB: loop body
LE: loop exit
PB: predicated region body
PF: predicated region fallthrough
CT: control target
= control target key end

     0   :  { %vm19_vm0 = vcmask 64512   ;;  %v583_v1 = vmov 0.0   ;;  %vm432_vm1 = vcmask 60416   ;;  %s769_s1 = inlined_call_operand.vmem [shape: bf16[128,8], index: 1, kind: input, shape index: {}]   ;;  %s770_s0 = inlined_call_operand.vmem [shape: bf16[128,128], index: 0, kind: input, shape index: {}]   ;;  %s771_s2 = inlined_call_operand.vmem [shape: f32[1,8], index: 2, kind: input, shape index: {}]   ;;  %s772_s3 = inlined_call_operand.vmem [shape: bf16[128,8], index: 3, kind: output, shape index: {}]  }
   0x1   :  { %v567_v0 = vld [vmem:[%s769_s1 + $0x38] sm:$0xff]   ;;  %22 = vst.msk [vmem:[#allocation2 + $0x10] sm:$0xff] %vm19_vm0, %v583_v1  ;;  %20 = vst.msk [vmem:[#allocation2] sm:$0xff] %vm19_vm0, %v583_v1  ;;  %v568_v2 = vld [vmem:[%s769_s1 + $0x30] sm:$0xff]  }
   0x2   :  { %21 = vst.msk [vmem:[#allocation2 + $0x8] sm:$0xff] %vm19_vm0, %v583_v1  ;;  %23 = vst.msk [vmem:[#allocation2 + $0x18] sm:$0xff] %vm19_vm0, %v583_v1  ;;  %518 = vmatprep.subr.bf16.mxu0 %v567_v0  ;;  %550 = vmatprep.subr.bf16.mxu1 %v567_v0  ;;  %v569_v3 = vld [vmem:[%s769_s1 + $0x28] sm:$0xff]   ;;  %v570_v4 = vld [vmem:[%s769_s1 + $0x20] sm:$0xff]  }
   0x3   :  { %24 = vst.msk [vmem:[#allocation2 + $0x20] sm:$0xff] %vm19_vm0, %v583_v1  ;;  %25 = vst.msk [vmem:[#allocation2 + $0x28] sm:$0xff] %vm19_vm0, %v583_v1  ;;  %519 = vmatpush3.bf16.msra.mxu0 %v567_v0  ;;  %558 = vmatpush3.bf16.msra.mxu1 %v567_v0  ;;  %v575_v5 = vld [vmem:[%s770_s0] sm:$0xff]   ;;  %v571_v7 = vld [vmem:[%s769_s1 + $0x18] sm:$0xff]  }
   0x4   :  { %26 = vst.msk [vmem:[#allocation2 + $0x30] sm:$0xff] %vm19_vm0, %v583_v1  ;;  %27 = vst.msk [vmem:[#allocation2 + $0x38] sm:$0xff] %vm19_vm0, %v583_v1  ;;  %520 = vmatprep.subr.bf16.mxu0 %v568_v2  ;;  %551 = vmatprep.subr.bf16.mxu1 %v568_v2  ;;  %v576_v6 = vld [vmem:[%s770_s0 + $0x20] sm:$0xff]   ;;  %v572_v8 = vld [vmem:[%s769_s1 + $0x10] sm:$0xff]  }
   0x5   :  { %28 = vst.msk [vmem:[#allocation2 + $0x40] sm:$0xff] %vm19_vm0, %v583_v1  ;;  %29 = vst.msk [vmem:[#allocation2 + $0x48] sm:$0xff] %vm19_vm0, %v583_v1  ;;  %534 = vmatprep.mubr.bf16.mxu0 %v575_v5  ;;  %542 = vmatprep.mubr.bf16.mxu1 %v576_v6  ;;  %v573_v9 = vld [vmem:[%s769_s1 + $0x8] sm:$0xff]   ;;  %v574_v10 = vld [vmem:[%s769_s1] sm:$0xff]  }
   0x6   :  { %30 = vst.msk [vmem:[#allocation2 + $0x50] sm:$0xff] %vm19_vm0, %v583_v1  ;;  %31 = vst.msk [vmem:[#allocation2 + $0x58] sm:$0xff] %vm19_vm0, %v583_v1  ;;  %v577_v11 = vld [vmem:[%s770_s0 + $0x8] sm:$0xff]   ;;  %v579_v13 = vld [vmem:[%s770_s0 + $0x10] sm:$0xff]  }
   0x7   :  { %32 = vst.msk [vmem:[#allocation2 + $0x60] sm:$0xff] %vm19_vm0, %v583_v1  ;;  %33 = vst.msk [vmem:[#allocation2 + $0x68] sm:$0xff] %vm19_vm0, %v583_v1  ;;  %521 = vmatpush3.bf16.msra.mxu0 %v568_v2  ;;  %559 = vmatpush3.bf16.msra.mxu1 %v568_v2  ;;  %v578_v12 = vld [vmem:[%s770_s0 + $0x28] sm:$0xff]   ;;  %v580_v14 = vld [vmem:[%s770_s0 + $0x30] sm:$0xff]  }
   0x8   :  { %34 = vst.msk [vmem:[#allocation2 + $0x70] sm:$0xff] %vm19_vm0, %v583_v1  ;;  %35 = vst.msk [vmem:[#allocation2 + $0x78] sm:$0xff] %vm19_vm0, %v583_v1  ;;  %522 = vmatprep.subr.bf16.mxu0 %v569_v3  ;;  %552 = vmatprep.subr.bf16.mxu1 %v569_v3  ;;  %v581_v15 = vld [vmem:[%s770_s0 + $0x18] sm:$0xff]   ;;  %v38_v17 = vld [vmem:[#allocation2 + $0x10] sm:$0xff] }
   0x9   :  { %v582_v16 = vld [vmem:[%s770_s0 + $0x38] sm:$0xff]   ;;  %v36_v21 = vld [vmem:[#allocation2] sm:$0xff]  ;;  %v37_v33 = vld [vmem:[#allocation2 + $0x8] sm:$0xff] }
   0xa   :  { %v39_v27 = vld [vmem:[#allocation2 + $0x18] sm:$0xff]  ;;  %v677_v43 = vld [vmem:[%s771_s2] ss:$0 sm:$0xff] }
   0xb   :  { %523 = vmatpush3.bf16.msra.mxu0 %v569_v3  ;;  %560 = vmatpush3.bf16.msra.mxu1 %v569_v3  ;;  %v42_v39 = vld [vmem:[#allocation2 + $0x30] sm:$0xff]  ;;  %v40_v46 = vld [vmem:[#allocation2 + $0x20] sm:$0xff]  ;;  %v43_v58 = vld [vmem:[#allocation2 + $0x38] sm:$0xff] }
   0xc   :  { %524 = vmatprep.subr.bf16.mxu0 %v570_v4  ;;  %553 = vmatprep.subr.bf16.mxu1 %v570_v4  ;;  %v44_v22 = vld [vmem:[#allocation2 + $0x40] sm:$0xff]  ;;  %v45_v34 = vld [vmem:[#allocation2 + $0x48] sm:$0xff] }
   0xd   :  { %v46_v18 = vld [vmem:[#allocation2 + $0x50] sm:$0xff]  ;;  %v47_v28 = vld [vmem:[#allocation2 + $0x58] sm:$0xff] }
   0xe   :  { %v48_v47 = vld [vmem:[#allocation2 + $0x60] sm:$0xff]  ;;  %v49_v5 = vld [vmem:[#allocation2 + $0x68] sm:$0xff] }
   0xf   :  { %525 = vmatpush3.bf16.msra.mxu0 %v570_v4  ;;  %561 = vmatpush3.bf16.msra.mxu1 %v570_v4  ;;  %v50_v40 = vld [vmem:[#allocation2 + $0x70] sm:$0xff]  ;;  %v51_v59 = vld [vmem:[#allocation2 + $0x78] sm:$0xff]  ;;  %v41_v4 = vld [vmem:[#allocation2 + $0x28] sm:$0xff] }
  0x10   :  { %526 = vmatprep.subr.bf16.mxu0 %v571_v7  ;;  %554 = vmatprep.subr.bf16.mxu1 %v571_v7 }
  0x13   :  { %527 = vmatpush3.bf16.msra.mxu0 %v571_v7  ;;  %562 = vmatpush3.bf16.msra.mxu1 %v571_v7 }
  0x14   :  { %528 = vmatprep.subr.bf16.mxu0 %v572_v8  ;;  %555 = vmatprep.subr.bf16.mxu1 %v572_v8 }
  0x17   :  { %529 = vmatpush3.bf16.msra.mxu0 %v572_v8  ;;  %563 = vmatpush3.bf16.msra.mxu1 %v572_v8 }
  0x18   :  { %530 = vmatprep.subr.bf16.mxu0 %v573_v9  ;;  %556 = vmatprep.subr.bf16.mxu1 %v573_v9 }
  0x1b   :  { %531 = vmatpush3.bf16.msra.mxu0 %v573_v9  ;;  %564 = vmatpush3.bf16.msra.mxu1 %v573_v9 }
  0x1c   :  { %532 = vmatprep.subr.bf16.mxu0 %v574_v10  ;;  %557 = vmatprep.subr.bf16.mxu1 %v574_v10 }
  0x1f   :  { %533 = vmatpush3.bf16.msra.mxu0 %v574_v10  ;;  %565 = vmatpush3.bf16.msra.mxu1 %v574_v10 }
  0x22   :  { %535 = vmatmul.mubr.bf16.vlgmr.msra.gmra.mxu0 %v577_v11  ;;  %543 = vmatmul.mubr.bf16.vlgmr.msra.gmra.mxu1 %v578_v12 }
  0x23   :  { %538 = vmatprep.mubr.bf16.mxu0 %v579_v13  ;;  %546 = vmatprep.mubr.bf16.mxu1 %v580_v14 }
  0x2a   :  { %539 = vmatmul.mubr.bf16.gmra.mxu0 %v581_v15  ;;  %547 = vmatmul.mubr.bf16.gmra.mxu1 %v582_v16 }
  0xe2   :  { %v536_v19 = vpop.f32.mrf.mxu0  ;;  %v544_v20 = vpop.f32.mrf.mxu1 }
  0xe3   :  { %v279_v23 = vadd.f32 %v536_v19, %v38_v17  ;;  %v287_v24 = vadd.f32 %v544_v20, %v46_v18 }
  0xe4   :  { %v214_v25 = vpop.f32.mrf.mxu0  ;;  %v246_v26 = vpop.f32.mrf.mxu1 }
  0xe5   :  { %296 = vst.msk [vmem:[#allocation2 + $0x10] sm:$0xff] %vm19_vm0, %v279_v23  ;;  %304 = vst.msk [vmem:[#allocation2 + $0x50] sm:$0xff] %vm19_vm0, %v287_v24  ;;  %v277_v29 = vadd.f32 %v214_v25, %v36_v21  ;;  %v285_v30 = vadd.f32 %v246_v26, %v44_v22 }
  0xe6   :  { %v537_v31 = vpop.f32.mrf.mxu0  ;;  %v545_v32 = vpop.f32.mrf.mxu1 }
  0xe7   :  { %294 = vst.msk [vmem:[#allocation2] sm:$0xff] %vm19_vm0, %v277_v29  ;;  %302 = vst.msk [vmem:[#allocation2 + $0x40] sm:$0xff] %vm19_vm0, %v285_v30  ;;  %v280_v35 = vadd.f32 %v537_v31, %v39_v27  ;;  %v288_v36 = vadd.f32 %v545_v32, %v47_v28 }
  0xe8   :  { %v217_v37 = vpop.f32.mrf.mxu0  ;;  %v249_v38 = vpop.f32.mrf.mxu1 }
  0xe9   :  { %297 = vst.msk [vmem:[#allocation2 + $0x18] sm:$0xff] %vm19_vm0, %v280_v35  ;;  %305 = vst.msk [vmem:[#allocation2 + $0x58] sm:$0xff] %vm19_vm0, %v288_v36  ;;  %v278_v41 = vadd.f32 %v217_v37, %v37_v33  ;;  %v286_v42 = vadd.f32 %v249_v38, %v45_v34 }
  0xea   :  { %v540_v44 = vpop.f32.mrf.mxu0  ;;  %v548_v45 = vpop.f32.mrf.mxu1 }
  0xeb   :  { %295 = vst.msk [vmem:[#allocation2 + $0x8] sm:$0xff] %vm19_vm0, %v278_v41  ;;  %303 = vst.msk [vmem:[#allocation2 + $0x48] sm:$0xff] %vm19_vm0, %v286_v42  ;;  %v283_v48 = vadd.f32 %v540_v44, %v42_v39  ;;  %v291_v49 = vadd.f32 %v548_v45, %v50_v40 }
  0xec   :  { %v315_v50 = vld [vmem:[#allocation2 + $0x10] sm:$0xff]  ;;  %v230_v52 = vpop.f32.mrf.mxu0  ;;  %v262_v53 = vpop.f32.mrf.mxu1 }
  0xed   :  { %v323_v51 = vld [vmem:[#allocation2 + $0x50] sm:$0xff]  ;;  %v338_v54 = vadd.f32 %v677_v43, %v315_v50  ;;  %300 = vst.msk [vmem:[#allocation2 + $0x30] sm:$0xff] %vm19_vm0, %v283_v48  ;;  %308 = vst.msk [vmem:[#allocation2 + $0x70] sm:$0xff] %vm19_vm0, %v291_v49  ;;  %v281_v56 = vadd.f32 %v230_v52, %v40_v46  ;;  %v289_v57 = vadd.f32 %v262_v53, %v48_v47 }
  0xee   :  { %v346_v55 = vadd.f32 %v677_v43, %v323_v51  ;;  %v313_v60 = vld [vmem:[#allocation2] sm:$0xff]  ;;  %v541_v62 = vpop.f32.mrf.mxu0  ;;  %v549_v63 = vpop.f32.mrf.mxu1 }
  0xef   :  { %v321_v61 = vld [vmem:[#allocation2 + $0x40] sm:$0xff]  ;;  %v354_v0 = vmax.f32 %v338_v54, 0.0  ;;  %v336_v2 = vadd.f32 %v677_v43, %v313_v60  ;;  %298 = vst.msk [vmem:[#allocation2 + $0x20] sm:$0xff] %vm19_vm0, %v281_v56  ;;  %306 = vst.msk [vmem:[#allocation2 + $0x60] sm:$0xff] %vm19_vm0, %v289_v57  ;;  %v284_v8 = vadd.f32 %v541_v62, %v43_v58  ;;  %v292_v9 = vadd.f32 %v549_v63, %v51_v59 }
  0xf0   :  { %v362_v1 = vmax.f32 %v346_v55, 0.0  ;;  %v344_v3 = vadd.f32 %v677_v43, %v321_v61  ;;  %v316_v6 = vld [vmem:[#allocation2 + $0x18] sm:$0xff]  ;;  %v233_v10 = vpop.f32.mrf.mxu0  ;;  %v265_v11 = vpop.f32.mrf.mxu1 }
  0xf1   :  { %v324_v7 = vld [vmem:[#allocation2 + $0x58] sm:$0xff]  ;;  %v488_v12 = vpack.c.bf16 %v354_v0, %v354_v0  ;;  %v352_v14 = vmax.f32 %v336_v2, 0.0  ;;  %v339_v16 = vadd.f32 %v677_v43, %v316_v6  ;;  %301 = vst.msk [vmem:[#allocation2 + $0x38] sm:$0xff] %vm19_vm0, %v284_v8  ;;  %309 = vst.msk [vmem:[#allocation2 + $0x78] sm:$0xff] %vm19_vm0, %v292_v9  ;;  %v282_v20 = vadd.f32 %v233_v10, %v41_v4 }
  0xf2   :  { %v496_v13 = vpack.c.bf16 %v362_v1, %v362_v1  ;;  %v360_v15 = vmax.f32 %v344_v3, 0.0  ;;  %v347_v17 = vadd.f32 %v677_v43, %v324_v7  ;;  %v314_v18 = vld [vmem:[#allocation2 + $0x8] sm:$0xff]  ;;  %v290_v21 = vadd.f32 %v265_v11, %v49_v5 }
  0xf3   :  { %v322_v19 = vld [vmem:[#allocation2 + $0x48] sm:$0xff]  ;;  %435 = vst.msk [vmem:[%s772_s3 + $0x8] sm:$0xf] %vm432_vm1, %v488_v12  ;;  %v486_v22 = vpack.c.bf16 %v352_v14, %v352_v14  ;;  %v337_v24 = vadd.f32 %v677_v43, %v314_v18  ;;  %v355_v26 = vmax.f32 %v339_v16, 0.0 }
  0xf4   :  { %443 = vst.msk [vmem:[%s772_s3 + $0x28] sm:$0xf] %vm432_vm1, %v496_v13  ;;  %v494_v23 = vpack.c.bf16 %v360_v15, %v360_v15  ;;  %v345_v25 = vadd.f32 %v677_v43, %v322_v19  ;;  %v363_v27 = vmax.f32 %v347_v17, 0.0  ;;  %v319_v28 = vld [vmem:[#allocation2 + $0x30] sm:$0xff] }
  0xf5   :  { %v327_v29 = vld [vmem:[#allocation2 + $0x70] sm:$0xff]  ;;  %299 = vst.msk [vmem:[#allocation2 + $0x28] sm:$0xff] %vm19_vm0, %v282_v20  ;;  %307 = vst.msk [vmem:[#allocation2 + $0x68] sm:$0xff] %vm19_vm0, %v290_v21  ;;  %v353_v30 = vmax.f32 %v337_v24, 0.0  ;;  %v342_v32 = vadd.f32 %v677_v43, %v319_v28  ;;  %v489_v34 = vpack.c.bf16 %v355_v26, %v355_v26 }
  0xf6   :  { %433 = vst.msk [vmem:[%s772_s3] sm:$0xf] %vm432_vm1, %v486_v22  ;;  %441 = vst.msk [vmem:[%s772_s3 + $0x20] sm:$0xf] %vm432_vm1, %v494_v23  ;;  %v361_v31 = vmax.f32 %v345_v25, 0.0  ;;  %v350_v33 = vadd.f32 %v677_v43, %v327_v29  ;;  %v497_v35 = vpack.c.bf16 %v363_v27, %v363_v27  ;;  %v317_v36 = vld [vmem:[#allocation2 + $0x20] sm:$0xff] }
  0xf7   :  { %v325_v37 = vld [vmem:[#allocation2 + $0x60] sm:$0xff]  ;;  %v487_v38 = vpack.c.bf16 %v353_v30, %v353_v30  ;;  %v358_v40 = vmax.f32 %v342_v32, 0.0  ;;  %436 = vst.msk [vmem:[%s772_s3 + $0xc] sm:$0xf] %vm432_vm1, %v489_v34  ;;  %v340_v42 = vadd.f32 %v677_v43, %v317_v36 }
  0xf8   :  { %v495_v39 = vpack.c.bf16 %v361_v31, %v361_v31  ;;  %v366_v41 = vmax.f32 %v350_v33, 0.0  ;;  %444 = vst.msk [vmem:[%s772_s3 + $0x2c] sm:$0xf] %vm432_vm1, %v497_v35  ;;  %v348_v44 = vadd.f32 %v677_v43, %v325_v37  ;;  %v320_v47 = vld [vmem:[#allocation2 + $0x38] sm:$0xff] }
  0xf9   :  { %434 = vst.msk [vmem:[%s772_s3 + $0x4] sm:$0xf] %vm432_vm1, %v487_v38  ;;  %v492_v45 = vpack.c.bf16 %v358_v40, %v358_v40  ;;  %v328_v48 = vld [vmem:[#allocation2 + $0x78] sm:$0xff]  ;;  %v356_v49 = vmax.f32 %v340_v42, 0.0  ;;  %v343_v51 = vadd.f32 %v677_v43, %v320_v47 }
  0xfa   :  { %442 = vst.msk [vmem:[%s772_s3 + $0x24] sm:$0xf] %vm432_vm1, %v495_v39  ;;  %v500_v46 = vpack.c.bf16 %v366_v41, %v366_v41  ;;  %v364_v50 = vmax.f32 %v348_v44, 0.0  ;;  %v351_v52 = vadd.f32 %v677_v43, %v328_v48 }
  0xfb   :  { %439 = vst.msk [vmem:[%s772_s3 + $0x18] sm:$0xf] %vm432_vm1, %v492_v45  ;;  %v490_v55 = vpack.c.bf16 %v356_v49, %v356_v49  ;;  %v359_v57 = vmax.f32 %v343_v51, 0.0 }
  0xfc   :  { %447 = vst.msk [vmem:[%s772_s3 + $0x38] sm:$0xf] %vm432_vm1, %v500_v46  ;;  %v318_v53 = vld [vmem:[#allocation2 + $0x28] sm:$0xff]  ;;  %v498_v56 = vpack.c.bf16 %v364_v50, %v364_v50  ;;  %v367_v58 = vmax.f32 %v351_v52, 0.0 }
  0xfd   :  { %v326_v54 = vld [vmem:[#allocation2 + $0x68] sm:$0xff]  ;;  %v341_v59 = vadd.f32 %v677_v43, %v318_v53  ;;  %437 = vst.msk [vmem:[%s772_s3 + $0x10] sm:$0xf] %vm432_vm1, %v490_v55  ;;  %v493_v61 = vpack.c.bf16 %v359_v57, %v359_v57 }
  0xfe   :  { %v349_v60 = vadd.f32 %v677_v43, %v326_v54  ;;  %445 = vst.msk [vmem:[%s772_s3 + $0x30] sm:$0xf] %vm432_vm1, %v498_v56  ;;  %v501_v62 = vpack.c.bf16 %v367_v58, %v367_v58 }
  0xff   :  { %v357_v63 = vmax.f32 %v341_v59, 0.0  ;;  %440 = vst.msk [vmem:[%s772_s3 + $0x1c] sm:$0xf] %vm432_vm1, %v493_v61 }
 0x100   :  { %v365_v0 = vmax.f32 %v349_v60, 0.0  ;;  %448 = vst.msk [vmem:[%s772_s3 + $0x3c] sm:$0xf] %vm432_vm1, %v501_v62 }
 0x101   :  { %v491_v43 = vpack.c.bf16 %v357_v63, %v357_v63 }
 0x102   :  { %v499_v1 = vpack.c.bf16 %v365_v0, %v365_v0 }
 0x103   :  { %438 = vst.msk [vmem:[%s772_s3 + $0x14] sm:$0xf] %vm432_vm1, %v491_v43 }
 0x104   :  { %446 = vst.msk [vmem:[%s772_s3 + $0x34] sm:$0xf] %vm432_vm1, %v499_v1 }

</bundles_post_ra>
